<compile_context>
chip_gen: v6e
topology: v6e:2x2x1
jax: 0.10.0
libtpu: 0.0.40
codegen_flags: <defaults>
</compile_context>

<pallas_src>
import functools

import jax
import jax.numpy as jnp
from jax.experimental import pallas as pl
from jax.experimental.pallas import tpu as pltpu


def _mbstd_kernel(x_ref, out_ref, *, HW, F, eps):
    """One grid step: a (G, M_blk) slab of statistics groups.

    x_ref  : (G, M_blk, C*HW)      -- lane-dense flattened (channel, pixel)
    out_ref: (G, M_blk, (C+F)*HW)  -- pass-through slab + F broadcast stat chans
    """
    G, M_blk, L = x_ref.shape                              # L == C*HW

    # 1) Pass-through copy: straight vld/vst in the input dtype (no f32
    #    round-trip on the byte-dominant path), one lane-dense slab store.
    out_ref[:, :, :L] = x_ref[...]

    # 2) Group statistics in f32 (two-pass, matches reference numerics).
    x = x_ref[...].astype(jnp.float32)                     # (G, M_blk, L)
    mu = jnp.mean(x, axis=0, keepdims=True)                # (1, M_blk, L)
    var = jnp.mean(jnp.square(x - mu), axis=0)             # (M_blk, L)
    std = jnp.sqrt(var + eps)                              # (M_blk, L)

    # 3) Average std over (c, H, W) within each stat-channel group f and write
    #    the broadcast stat tail.  Only these tiny F*HW-lane stores may be
    #    masked; F is typically 1.
    seg = L // F                                           # = c * HW
    for f in range(F):
        stat_f = jnp.mean(std[:, f * seg:(f + 1) * seg],
                          axis=-1, keepdims=True)          # (M_blk, 1)
        tail = jnp.broadcast_to(stat_f[None, :, :], (G, M_blk, HW))
        out_ref[:, :, L + f * HW: L + (f + 1) * HW] = tail.astype(out_ref.dtype)


def _pick_m_block(M, per_m_bytes, budget_bytes):
    """Largest M block that fits the double-buffered VMEM budget while keeping
    the block's second-minor dim either equal to the full M or 8-aligned."""
    fit = max(1, budget_bytes // (2 * per_m_bytes))
    if fit >= M:
        # Whole-M block fits.  If M splits into two 8-aligned halves, use two
        # grid steps so both v7x TensorCores get work; otherwise a single step
        # (v5e/v6e have one TC, so collapsing the grid is strictly better).
        if M % 16 == 0:
            return M // 2
        return M
    mb = (fit // 8) * 8
    while mb >= 8:
        if M % mb == 0:
            return mb
        mb -= 8
    # TODO(synk): pathological case (huge per-group block with no 8-aligned
    # divisor of M that fits) — fall back to whole-M and rely on the VMEM limit.
    return M


def minibatch_stddev_pallas(x, group_size, num_channels=1, eps=1e-8):
    """x: (N, C, H, W) -> (N, C + num_channels, H, W)."""
    N, C, H, W = x.shape
    G = group_size if N % group_size == 0 else N
    M = N // G
    F = num_channels
    assert C % F == 0, (C, F)
    HW = H * W
    L_in = C * HW
    L_out = (C + F) * HW
    itemsize = jnp.dtype(x.dtype).itemsize

    # Free contiguous reshape: sample n = g*M + m  ->  x3[g, m]; (channel,
    # pixel) folded into the lane axis for lane-dense loads/stores.
    x3 = x.reshape(G, M, L_in)

    per_m_bytes = G * (L_in + L_out) * itemsize
    m_blk = _pick_m_block(M, per_m_bytes, budget_bytes=10 * 2**20)
    num_steps = pl.cdiv(M, m_blk)                          # m_blk divides M

    # Scoped-VMEM limit: double-buffered in/out blocks + f32 temps + margin.
    in_block = G * m_blk * L_in * itemsize
    out_block = G * m_blk * L_out * itemsize
    f32_block = G * m_blk * L_in * 4
    vmem_limit = 2 * (in_block + out_block) + 3 * f32_block + (2 << 20)
    vmem_limit = int(min(max(vmem_limit, 16 << 20), 48 << 20))

    kernel = functools.partial(_mbstd_kernel, HW=HW, F=F, eps=eps)

    out3 = pl.pallas_call(
        kernel,
        out_shape=jax.ShapeDtypeStruct((G, M, L_out), x.dtype),
        grid=(num_steps,),
        in_specs=[pl.BlockSpec((G, m_blk, L_in), lambda i: (0, i, 0))],
        out_specs=pl.BlockSpec((G, m_blk, L_out), lambda i: (0, i, 0)),
        compiler_params=pltpu.CompilerParams(
            dimension_semantics=("parallel",),
            vmem_limit_bytes=vmem_limit),
    )(x3)

    # Free reshape back to NCHW with the appended stat channel(s).
    return out3.reshape(N, C + F, H, W)


def minibatch_stddev_reference(x, group_size, num_channels=1, eps=1e-8):
    """Pure-JAX translation of the PyTorch forward (source of truth)."""
    N, C, H, W = x.shape
    G = group_size if N % group_size == 0 else N
    F = num_channels
    c = C // F
    y = x.reshape(G, -1, F, c, H, W)
    y = y - jnp.mean(y, axis=0)
    y = jnp.mean(jnp.square(y), axis=0)
    y = jnp.sqrt(y + eps)
    y = jnp.mean(y, axis=(2, 3, 4))              # (M, F)
    y = y.reshape(-1, F, 1, 1)
    y = jnp.tile(y, (G, 1, H, W))                # (N, F, H, W)
    return jnp.concatenate([x, y], axis=1)


if __name__ == "__main__":
    # Small deterministic shapes: batch=8, channels=4, spatial=16x16.
    N, C, H, W = 8, 4, 16, 16
    key = jax.random.PRNGKey(0)
    x = jax.random.normal(key, (N, C, H, W), dtype=jnp.float32)

    # Case 1: group_size divides N -> G=4, M=2.
    out = jax.block_until_ready(minibatch_stddev_pallas(x, 4, 1))
    ref = jax.block_until_ready(minibatch_stddev_reference(x, 4, 1))
    assert out.shape == (N, C + 1, H, W), out.shape
    assert jnp.allclose(out, ref, atol=1e-5, rtol=1e-5), \
        float(jnp.max(jnp.abs(out - ref)))

    # Case 2: group_size does not divide N -> fallback G=N, M=1.
    out2 = jax.block_until_ready(minibatch_stddev_pallas(x, 3, 1))
    ref2 = jax.block_until_ready(minibatch_stddev_reference(x, 3, 1))
    assert jnp.allclose(out2, ref2, atol=1e-5, rtol=1e-5), \
        float(jnp.max(jnp.abs(out2 - ref2)))

    # Case 3: num_channels > 1 (F=2, c=2).
    out3 = jax.block_until_ready(minibatch_stddev_pallas(x, 4, 2))
    ref3 = jax.block_until_ready(minibatch_stddev_reference(x, 4, 2))
    assert out3.shape == (N, C + 2, H, W), out3.shape
    assert jnp.allclose(out3, ref3, atol=1e-5, rtol=1e-5), \
        float(jnp.max(jnp.abs(out3 - ref3)))

    print("KERNEL_OK")
</pallas_src>

<mosaic_0001>
module attributes {stable_mosaic.version = 11 : i64} {
  func.func @_mbstd_kernel(%arg0: i32, %arg1: memref<4x2x1024xf32, #tpu.memory_space<vmem>>, %arg2: memref<4x2x1280xf32, #tpu.memory_space<vmem>>) attributes {dimension_semantics = [#tpu.dimension_semantics<parallel>], iteration_bounds = array<i64: 1>, scalar_prefetch = 0 : i64, scratch_operands = 0 : i64, tpu.core_type = #tpu.core_type<tc>, window_params = [{transform_indices = @transform_0, window_bounds = array<i64: 4, 2, 1024>}, {transform_indices = @transform_1, window_bounds = array<i64: 4, 2, 1280>}]} {
    %c0 = arith.constant 0 : index
    %c0_0 = arith.constant 0 : index
    %c0_1 = arith.constant 0 : index
    %0 = vector.load %arg1[%c0, %c0_0, %c0_1] : memref<4x2x1024xf32, #tpu.memory_space<vmem>>, vector<4x2x1024xf32>
    %c0_2 = arith.constant 0 : index
    %c0_3 = arith.constant 0 : index
    %c0_4 = arith.constant 0 : index
    %1 = vector.load %arg2[%c0_2, %c0_3, %c0_4] : memref<4x2x1280xf32, #tpu.memory_space<vmem>>, vector<4x2x1024xf32>
    tpu.vector_store %arg2[%c0_2, %c0_3, %c0_4], %0 {strides = array<i32>} : memref<4x2x1280xf32, #tpu.memory_space<vmem>>, vector<4x2x1024xf32>,
    %c0_5 = arith.constant 0 : index
    %c0_6 = arith.constant 0 : index
    %c0_7 = arith.constant 0 : index
    %2 = vector.load %arg1[%c0_5, %c0_6, %c0_7] : memref<4x2x1024xf32, #tpu.memory_space<vmem>>, vector<4x2x1024xf32>
    %cst = arith.constant dense<0.000000e+00> : vector<2x1024xf32>
    %3 = vector.multi_reduction <add>, %2, %cst [0] : vector<4x2x1024xf32> to vector<2x1024xf32>
    %4 = vector.shape_cast %3 : vector<2x1024xf32> to vector<1x2x1024xf32>
    %cst_8 = arith.constant 4.000000e+00 : f32
    %5 = vector.broadcast %cst_8 : f32 to vector<1x2x1024xf32>
    %6 = arith.divf %4, %5 : vector<1x2x1024xf32>
    %7 = vector.broadcast %6 : vector<1x2x1024xf32> to vector<4x2x1024xf32>
    %8 = arith.subf %2, %7 : vector<4x2x1024xf32>
    %9 = arith.mulf %8, %8 : vector<4x2x1024xf32>
    %cst_9 = arith.constant dense<0.000000e+00> : vector<2x1024xf32>
    %10 = vector.multi_reduction <add>, %9, %cst_9 [0] : vector<4x2x1024xf32> to vector<2x1024xf32>
    %cst_10 = arith.constant 4.000000e+00 : f32
    %11 = vector.broadcast %cst_10 : f32 to vector<2x1024xf32>
    %12 = arith.divf %10, %11 : vector<2x1024xf32>
    %cst_11 = arith.constant 9.99999993E-9 : f32
    %13 = vector.broadcast %cst_11 : f32 to vector<2x1024xf32>
    %14 = arith.addf %12, %13 : vector<2x1024xf32>
    %15 = math.sqrt %14 : vector<2x1024xf32>
    %cst_12 = arith.constant dense<0.000000e+00> : vector<2xf32>
    %16 = vector.multi_reduction <add>, %15, %cst_12 [1] : vector<2x1024xf32> to vector<2xf32>
    %17 = vector.shape_cast %16 : vector<2xf32> to vector<2x1xf32>
    %cst_13 = arith.constant 1.024000e+03 : f32
    %18 = vector.broadcast %cst_13 : f32 to vector<2x1xf32>
    %19 = arith.divf %17, %18 : vector<2x1xf32>
    %20 = vector.shape_cast %19 : vector<2x1xf32> to vector<1x2x1xf32>
    %21 = vector.shape_cast %20 : vector<1x2x1xf32> to vector<1x2x1xf32>
    %22 = vector.broadcast %21 : vector<1x2x1xf32> to vector<4x2x256xf32>
    %c0_14 = arith.constant 0 : index
    %c0_15 = arith.constant 0 : index
    %c1024 = arith.constant 1024 : index
    %23 = vector.load %arg2[%c0_14, %c0_15, %c1024] : memref<4x2x1280xf32, #tpu.memory_space<vmem>>, vector<4x2x256xf32>
    tpu.vector_store %arg2[%c0_14, %c0_15, %c1024], %22 {strides = array<i32>} : memref<4x2x1280xf32, #tpu.memory_space<vmem>>, vector<4x2x256xf32>,
    return
  }
  func.func @transform_0(%arg0: i32) -> (i32, i32, i32) {
    %c0_i32 = arith.constant 0 : i32
    %c0_i32_0 = arith.constant 0 : i32
    %c0_i32_1 = arith.constant 0 : i32
    return %c0_i32, %arg0, %c0_i32_0 : i32, i32, i32
  }
  func.func @transform_1(%arg0: i32) -> (i32, i32, i32) {
    %c0_i32 = arith.constant 0 : i32
    %c0_i32_0 = arith.constant 0 : i32
    %c0_i32_1 = arith.constant 0 : i32
    return %c0_i32, %arg0, %c0_i32_0 : i32, i32, i32
  }
}

</mosaic_0001>

<bundles_post_ra>
// kernel: tpu_custom_call.1
= control target key start
LH: loop header
LB: loop body
LE: loop exit
PB: predicated region body
PF: predicated region fallthrough
CT: control target
= control target key end

     0   :  { %6 = vsyncpa [#allocation3], 0  ;;  %s1084_s0 = inlined_call_operand.hbm [shape: f32[4,2,1024], index: 0, kind: input, shape index: {}]   ;;  %s1085_s1 = inlined_call_operand.hbm [shape: f32[4,2,1280], index: 1, kind: output, shape index: {}]  }
   0x1   :  { %7 = vsyncpa [#allocation4], 0  ;;  %s778_s6 = smov [#allocation2]  }
   0x2   :  { %s13_s7 = sshll.u32 %s778_s6, 4  ;;  %s14_s7 = int_to_ptr.vmem [resolvable:$true] %s13_s7 }
   0x3   :  { %s742_s8 = scalar_lea.vmem %s14_s7, 1024  ;;  %p747_p1 = scmp.lt.s32.totalorder %s14_s7, %s14_s7 }
   0x4   :  { %p743_p0 = scmp.ne.s32.totalorder %s14_s7, %s742_s8  ;;  %p748_p2 = scmp.lt.s32.totalorder %s742_s8, %s742_s8 }
   0x6   :  { %p749_p3 = por %p748_p2, %p747_p1 }
   0x8   :  { %p750_p4 = pnand %p749_p3, %p743_p0 }
   0xa   :  { %753 = shalt.err (!%p750_p4)
}
   0xb   :  { %s779_s9 = smov 256   ;;  %s780_s10 = smov 16  }
   0xc   :  { %19 = dma.hbm_to_vmem [thread:$0]  %s1084_s0, 1024, %s14_s7, [#allocation3], %s779_s9, %s779_s9, %s780_s10  }
   0xd   :  { %774 = dma.done.wait [#allocation3], 1024  }
   0xe   :  { %775 = vsyncadd [#allocation3], 4294966272  ;;  %v59_v0 = vlaneseq  ;;  %v781_v1 = vmov 1983009808   ;;  %v804_v6 = vld [vmem:[#allocation2] sm:$0xff]  ;;  %v806_v7 = vld [vmem:[#allocation2 + $0x8] sm:$0xff] }
   0xf   :  { %v57_v2 = vunpack.c.l.s4 %v781_v1  ;;  %v808_v8 = vld [vmem:[#allocation2 + $0x10] sm:$0xff]  ;;  %vm223_vm0 = vcmask 1041408   ;;  %v810_v9 = vld [vmem:[#allocation2 + $0x18] sm:$0xff]  ;;  %v812_v10 = vld [vmem:[#allocation2 + $0x20] sm:$0xff]  ;;  %31 = vst [vmem:[#allocation5] sm:$0xff] %v804_v6  ;;  %v55_v12 = vcombine.high %v804_v6, %v804_v6  ;;  %v72_v14 = vcombine.high %v806_v7, %v806_v7  ;;  %s783_s0 = smov [#allocation5]  }
  0x10   :  { %v799_v3 = vshrl.u32 %v59_v0, 7  ;;  %v814_v11 = vld [vmem:[#allocation2 + $0x28] sm:$0xff]  ;;  %32 = vst [vmem:[#allocation5 + $0x8] sm:$0xff] %v806_v7  ;;  %33 = vst [vmem:[#allocation5 + $0x14] sm:$0xff] %v808_v8  ;;  %v829_v16 = vld [vmem:[#allocation2 + $0x30] sm:$0xff]  ;;  %v89_v18 = vcombine.high %v808_v8, %v808_v8  ;;  %v106_v20 = vcombine.high %v810_v9, %v810_v9  ;;  %v123_v32 = vcombine.high %v812_v10, %v812_v10  ;;  %s690_s13 = sshll.u32 %s783_s0, 4  ;;  %s691_s13 = int_to_ptr.vmem [resolvable:$true] %s690_s13 }
  0x11   :  { %v58_v4 = vunpack.c.0.s8 %v57_v2  ;;  %v831_v17 = vld [vmem:[#allocation2 + $0x38] sm:$0xff]  ;;  %34 = vst [vmem:[#allocation5 + $0x1c] sm:$0xff] %v810_v9  ;;  %35 = vst [vmem:[#allocation5 + $0x28] sm:$0xff] %v812_v10  ;;  %v140_v36 = vcombine.high %v814_v11, %v814_v11  ;;  %v157_v40 = vcombine.high %v829_v16, %v829_v16  ;;  %s754_s14 = scalar_lea.vmem %s691_s13, 1280  ;;  %p759_p6 = scmp.lt.s32.totalorder %s691_s13, %s691_s13 }
  0x12   :  { %36 = vst [vmem:[#allocation5 + $0x30] sm:$0xff] %v814_v11  ;;  %37 = vst [vmem:[#allocation5 + $0x3c] sm:$0xff] %v829_v16  ;;  %v174_v44 = vcombine.high %v831_v17, %v831_v17  ;;  %p755_p5 = scmp.ne.s32.totalorder %s691_s13, %s754_s14  ;;  %p760_p7 = scmp.lt.s32.totalorder %s754_s14, %s754_s14 }
  0x13   :  { %v802_v5 = vsub.s32 %v58_v4, %v799_v3  ;;  %38 = vst [vmem:[#allocation5 + $0x44] sm:$0xff] %v831_v17 }
  0x14   :  { %p761_p8 = por %p760_p7, %p759_p6 }
  0x15   :  { %v62_v13 = vrot.slane %v804_v6, %v802_v5  ;;  %v827_v15 = vrot.slane %v806_v7, %v802_v5  ;;  %v96_v19 = vrot.slane %v808_v8, %v802_v5  ;;  %v844_v21 = vrot.slane %v810_v9, %v802_v5 }
  0x16   :  { %v69_v22 = vrot.slane %v55_v12, %v802_v5  ;;  %v850_v24 = vrot.slane %v72_v14, %v802_v5  ;;  %v103_v26 = vrot.slane %v89_v18, %v802_v5  ;;  %v856_v28 = vrot.slane %v106_v20, %v802_v5  ;;  %p762_p9 = pnand %p761_p8, %p755_p5 }
  0x17   :  { %v70_v23 = vcombine.high %v62_v13, %v62_v13  ;;  %v87_v25 = vcombine.high %v827_v15, %v827_v15  ;;  %v104_v27 = vcombine.high %v96_v19, %v96_v19  ;;  %v121_v29 = vcombine.high %v844_v21, %v844_v21 }
  0x18   :  { %v71_v30 = vcombine.high %v69_v22, %v69_v22  ;;  %v88_v31 = vcombine.high %v850_v24, %v850_v24  ;;  %v130_v33 = vrot.slane %v812_v10, %v802_v5  ;;  %v105_v34 = vcombine.high %v103_v26, %v103_v26 }
  0x19   :  { %v122_v35 = vcombine.high %v856_v28, %v856_v28  ;;  %v147_v37 = vrot.slane %v814_v11, %v802_v5  ;;  %v137_v38 = vrot.slane %v123_v32, %v802_v5  ;;  %v164_v41 = vrot.slane %v829_v16, %v802_v5 }
  0x1a   :  { %v138_v39 = vcombine.high %v130_v33, %v130_v33  ;;  %v154_v42 = vrot.slane %v140_v36, %v802_v5  ;;  %v181_v45 = vrot.slane %v831_v17, %v802_v5  ;;  %v171_v47 = vrot.slane %v157_v40, %v802_v5 }
  0x1b   :  { %v155_v43 = vcombine.high %v147_v37, %v147_v37  ;;  %v139_v46 = vcombine.high %v137_v38, %v137_v38  ;;  %v172_v48 = vcombine.high %v164_v41, %v164_v41  ;;  %v224_v49 = vsel %vm223_vm0, %v62_v13, 0.0 }
  0x1c   :  { %v156_v50 = vcombine.high %v154_v42, %v154_v42  ;;  %v188_v51 = vrot.slane %v174_v44, %v802_v5  ;;  %v189_v52 = vcombine.high %v181_v45, %v181_v45  ;;  %v225_v53 = vsel %vm223_vm0, %v96_v19, 0.0 }
  0x1d   :  { %v173_v54 = vcombine.high %v171_v47, %v171_v47  ;;  %v226_v55 = vadd.f32 %v225_v53, %v224_v49  ;;  %v227_v56 = vsel %vm223_vm0, %v130_v33, 0.0  ;;  %v229_v57 = vsel %vm223_vm0, %v164_v41, 0.0 }
  0x1e   :  { %v190_v58 = vcombine.high %v188_v51, %v188_v51  ;;  %v231_v59 = vsel %vm223_vm0, %v70_v23, 0.0  ;;  %v232_v60 = vsel %vm223_vm0, %v104_v27, 0.0  ;;  %v234_v61 = vsel %vm223_vm0, %v138_v39, 0.0 }
  0x1f   :  { %v228_v62 = vadd.f32 %v227_v56, %v226_v55  ;;  %v233_v63 = vadd.f32 %v232_v60, %v231_v59  ;;  %v236_v0 = vsel %vm223_vm0, %v172_v48, 0.0  ;;  %v238_v1 = vsel %vm223_vm0, %v69_v22, 0.0 }
  0x20   :  { %v239_v2 = vsel %vm223_vm0, %v103_v26, 0.0  ;;  %v241_v4 = vsel %vm223_vm0, %v137_v38, 0.0  ;;  %v243_v12 = vsel %vm223_vm0, %v171_v47, 0.0  ;;  %v245_v13 = vsel %vm223_vm0, %v71_v30, 0.0 }
  0x21   :  { %v230_v14 = vadd.f32 %v229_v57, %v228_v62  ;;  %v235_v18 = vadd.f32 %v234_v61, %v233_v63  ;;  %v240_v19 = vadd.f32 %v239_v2, %v238_v1  ;;  %v246_v20 = vsel %vm223_vm0, %v105_v34, 0.0 }
  0x22   :  { %v247_v23 = vadd.f32 %v246_v20, %v245_v13  ;;  %v248_v27 = vsel %vm223_vm0, %v139_v46, 0.0  ;;  %v250_v32 = vsel %vm223_vm0, %v173_v54, 0.0  ;;  %v252_v22 = vsel %vm223_vm0, %v827_v15, 0.0 }
  0x23   :  { %v237_v26 = vadd.f32 %v236_v0, %v235_v18  ;;  %v242_v33 = vadd.f32 %v241_v4, %v240_v19  ;;  %v253_v36 = vsel %vm223_vm0, %v844_v21, 0.0  ;;  %v255_v30 = vsel %vm223_vm0, %v147_v37, 0.0 }
  0x24   :  { %v249_v38 = vadd.f32 %v248_v27, %v247_v23  ;;  %v254_v39 = vadd.f32 %v253_v36, %v252_v22  ;;  %v257_v40 = vsel %vm223_vm0, %v181_v45, 0.0  ;;  %v259_v34 = vsel %vm223_vm0, %v87_v25, 0.0 }
  0x25   :  { %v244_v41 = vadd.f32 %v243_v12, %v242_v33  ;;  %v260_v44 = vsel %vm223_vm0, %v121_v29, 0.0  ;;  %v262_v46 = vsel %vm223_vm0, %v155_v43, 0.0  ;;  %v264_v15 = vsel %vm223_vm0, %v189_v52, 0.0 }
  0x26   :  { %v251_v47 = vadd.f32 %v250_v32, %v249_v38  ;;  %v256_v48 = vadd.f32 %v255_v30, %v254_v39  ;;  %v261_v49 = vadd.f32 %v260_v44, %v259_v34  ;;  %v266_v21 = vsel %vm223_vm0, %v850_v24, 0.0 }
  0x27   :  { %v267_v37 = vsel %vm223_vm0, %v856_v28, 0.0  ;;  %v269_v45 = vsel %vm223_vm0, %v154_v42, 0.0  ;;  %v271_v25 = vsel %vm223_vm0, %v188_v51, 0.0  ;;  %v273_v29 = vsel %vm223_vm0, %v88_v31, 0.0 }
  0x28   :  { %v258_v43 = vadd.f32 %v257_v40, %v256_v48  ;;  %v263_v52 = vadd.f32 %v262_v46, %v261_v49  ;;  %v268_v53 = vadd.f32 %v267_v37, %v266_v21  ;;  %v274_v54 = vsel %vm223_vm0, %v122_v35, 0.0 }
  0x29   :  { %v275_v55 = vadd.f32 %v274_v54, %v273_v29  ;;  %v276_v56 = vsel %vm223_vm0, %v156_v50, 0.0  ;;  %v278_v42 = vsel %vm223_vm0, %v190_v58, 0.0  ;;  %v281_v57 = vmul.f32 0.25, %v230_v14 }
  0x2a   :  { %v265_v51 = vadd.f32 %v264_v15, %v263_v52  ;;  %v270_v59 = vadd.f32 %v269_v45, %v268_v53  ;;  %v282_v60 = vmul.f32 0.25, %v237_v26  ;;  %v283_v24 = vmul.f32 0.25, %v244_v41 }
  0x2b   :  { %v277_v61 = vadd.f32 %v276_v56, %v275_v55  ;;  %v284_v31 = vmul.f32 0.25, %v251_v47  ;;  %v285_v62 = vmul.f32 0.25, %v258_v43 }
  0x2c   :  { %v272_v63 = vadd.f32 %v271_v25, %v270_v59  ;;  %v286_v0 = vmul.f32 0.25, %v265_v51  ;;  %v297_v1 = vcombine.low %v281_v57, %v282_v60 }
  0x2d   :  { %v279_v2 = vadd.f32 %v278_v42, %v277_v61  ;;  %v298_v28 = vcombine.low %v283_v24, %v284_v31 }
  0x2e   :  { %v287_v4 = vmul.f32 0.25, %v272_v63  ;;  %v305_v35 = vrot.slane %v297_v1, %v802_v5  ;;  %v314_v12 = vcombine.low %v285_v62, %v286_v0 }
  0x2f   :  { %v288_v50 = vmul.f32 0.25, %v279_v2  ;;  %v312_v58 = vrot.slane %v298_v28, %v802_v5 }
  0x30   :  { %v322_v18 = vrot.slane %v314_v12, %v802_v5 }
  0x31   :  { %v313_v13 = vcombine.low %v305_v35, %v312_v58  ;;  %v315_v14 = vcombine.low %v287_v4, %v288_v50 }
  0x33   :  { %v329_v19 = vrot.slane %v315_v14, %v802_v5  ;;  %v333_v20 = vsub.f32 %v804_v6, %v313_v13  ;;  %v335_v23 = vsub.f32 %v808_v8, %v313_v13  ;;  %v337_v27 = vsub.f32 %v812_v10, %v313_v13 }
  0x34   :  { %v339_v32 = vsub.f32 %v829_v16, %v313_v13 }
  0x35   :  { %v330_v22 = vcombine.low %v322_v18, %v329_v19  ;;  %v341_v26 = vmul.f32 %v333_v20, %v333_v20  ;;  %v343_v33 = vmul.f32 %v335_v23, %v335_v23  ;;  %v345_v36 = vmul.f32 %v337_v27, %v337_v27 }
  0x36   :  { %v347_v30 = vmul.f32 %v339_v32, %v339_v32 }
  0x37   :  { %v334_v38 = vsub.f32 %v806_v7, %v330_v22  ;;  %v336_v39 = vsub.f32 %v810_v9, %v330_v22  ;;  %v338_v40 = vsub.f32 %v814_v11, %v330_v22  ;;  %v340_v34 = vsub.f32 %v831_v17, %v330_v22 }
  0x38   :  { %v357_v6 = vcombine.high %v341_v26, %v341_v26  ;;  %v364_v8 = vrot.slane %v341_v26, %v802_v5  ;;  %v391_v41 = vcombine.high %v343_v33, %v343_v33  ;;  %v398_v10 = vrot.slane %v343_v33, %v802_v5 }
  0x39   :  { %v342_v16 = vmul.f32 %v334_v38, %v334_v38  ;;  %v344_v44 = vmul.f32 %v336_v39, %v336_v39  ;;  %v346_v46 = vmul.f32 %v338_v40, %v338_v40  ;;  %v348_v15 = vmul.f32 %v340_v34, %v340_v34 }
  0x3a   :  { %v371_v47 = vrot.slane %v357_v6, %v802_v5  ;;  %v372_v48 = vcombine.high %v364_v8, %v364_v8  ;;  %v405_v7 = vrot.slane %v391_v41, %v802_v5  ;;  %v406_v9 = vcombine.high %v398_v10, %v398_v10 }
  0x3b   :  { %v374_v49 = vcombine.high %v342_v16, %v342_v16  ;;  %v943_v11 = vrot.slane %v342_v16, %v802_v5  ;;  %v408_v17 = vcombine.high %v344_v44, %v344_v44  ;;  %v946_v21 = vrot.slane %v344_v44, %v802_v5 }
  0x3c   :  { %v373_v37 = vcombine.high %v371_v47, %v371_v47  ;;  %v407_v45 = vcombine.high %v405_v7, %v405_v7  ;;  %v425_v25 = vcombine.high %v345_v36, %v345_v36  ;;  %v432_v29 = vrot.slane %v345_v36, %v802_v5 }
  0x3d   :  { %v950_v43 = vrot.slane %v374_v49, %v802_v5  ;;  %v389_v52 = vcombine.high %v943_v11, %v943_v11  ;;  %v955_v53 = vrot.slane %v408_v17, %v802_v5  ;;  %v423_v54 = vcombine.high %v946_v21, %v946_v21 }
  0x3e   :  { %v439_v55 = vrot.slane %v425_v25, %v802_v5  ;;  %v440_v56 = vcombine.high %v432_v29, %v432_v29  ;;  %v442_v42 = vcombine.high %v346_v46, %v346_v46  ;;  %v449_v57 = vrot.slane %v346_v46, %v802_v5 }
  0x3f   :  { %v390_v51 = vcombine.high %v950_v43, %v950_v43  ;;  %v424_v59 = vcombine.high %v955_v53, %v955_v53  ;;  %v459_v60 = vcombine.high %v347_v30, %v347_v30  ;;  %v466_v24 = vrot.slane %v347_v30, %v802_v5 }
  0x40   :  { %v441_v61 = vcombine.high %v439_v55, %v439_v55  ;;  %v456_v31 = vrot.slane %v442_v42, %v802_v5  ;;  %v457_v62 = vcombine.high %v449_v57, %v449_v57  ;;  %v476_v63 = vcombine.high %v348_v15, %v348_v15 }
  0x41   :  { %v473_v0 = vrot.slane %v459_v60, %v802_v5  ;;  %v474_v1 = vcombine.high %v466_v24, %v466_v24  ;;  %v483_v2 = vrot.slane %v348_v15, %v802_v5  ;;  %v525_v28 = vsel %vm223_vm0, %v364_v8, 0.0 }
  0x42   :  { %v458_v4 = vcombine.high %v456_v31, %v456_v31  ;;  %v490_v35 = vrot.slane %v476_v63, %v802_v5  ;;  %v526_v12 = vsel %vm223_vm0, %v398_v10, 0.0  ;;  %v528_v50 = vsel %vm223_vm0, %v432_v29, 0.0 }
  0x43   :  { %v475_v58 = vcombine.high %v473_v0, %v473_v0  ;;  %v491_v13 = vcombine.high %v483_v2, %v483_v2  ;;  %v527_v14 = vadd.f32 %v526_v12, %v525_v28  ;;  %v530_v18 = vsel %vm223_vm0, %v466_v24, 0.0 }
  0x44   :  { %v492_v19 = vcombine.high %v490_v35, %v490_v35  ;;  %v532_v20 = vsel %vm223_vm0, %v372_v48, 0.0  ;;  %v533_v23 = vsel %vm223_vm0, %v406_v9, 0.0  ;;  %v535_v27 = vsel %vm223_vm0, %v440_v56, 0.0 }
  0x45   :  { %v529_v32 = vadd.f32 %v528_v50, %v527_v14  ;;  %v534_v22 = vadd.f32 %v533_v23, %v532_v20  ;;  %v537_v5 = vsel %vm223_vm0, %v474_v1, 0.0  ;;  %v539_v26 = vsel %vm223_vm0, %v371_v47, 0.0 }
  0x46   :  { %v540_v33 = vsel %vm223_vm0, %v405_v7, 0.0  ;;  %v542_v36 = vsel %vm223_vm0, %v439_v55, 0.0  ;;  %v544_v30 = vsel %vm223_vm0, %v473_v0, 0.0  ;;  %v546_v38 = vsel %vm223_vm0, %v373_v37, 0.0 }
  0x47   :  { %v531_v39 = vadd.f32 %v530_v18, %v529_v32  ;;  %v536_v40 = vadd.f32 %v535_v27, %v534_v22  ;;  %v541_v34 = vadd.f32 %v540_v33, %v539_v26  ;;  %v547_v6 = vsel %vm223_vm0, %v407_v45, 0.0 }
  0x48   :  { %v548_v8 = vadd.f32 %v547_v6, %v546_v38  ;;  %v549_v41 = vsel %vm223_vm0, %v441_v61, 0.0  ;;  %v551_v10 = vsel %vm223_vm0, %v475_v58, 0.0  ;;  %v553_v16 = vsel %vm223_vm0, %v943_v11, 0.0 }
  0x49   :  { %v538_v44 = vadd.f32 %v537_v5, %v536_v40  ;;  %v543_v46 = vadd.f32 %v542_v36, %v541_v34  ;;  %v554_v15 = vsel %vm223_vm0, %v946_v21, 0.0  ;;  %v556_v47 = vsel %vm223_vm0, %v449_v57, 0.0 }
  0x4a   :  { %v550_v48 = vadd.f32 %v549_v41, %v548_v8  ;;  %v555_v7 = vadd.f32 %v554_v15, %v553_v16  ;;  %v558_v9 = vsel %vm223_vm0, %v483_v2, 0.0  ;;  %v560_v49 = vsel %vm223_vm0, %v389_v52, 0.0 }
  0x4b   :  { %v545_v17 = vadd.f32 %v544_v30, %v543_v46  ;;  %v561_v37 = vsel %vm223_vm0, %v423_v54, 0.0  ;;  %v563_v45 = vsel %vm223_vm0, %v457_v62, 0.0  ;;  %v565_v11 = vsel %vm223_vm0, %v491_v13, 0.0 }
  0x4c   :  { %v552_v25 = vadd.f32 %v551_v10, %v550_v48  ;;  %v557_v29 = vadd.f32 %v556_v47, %v555_v7  ;;  %v562_v55 = vadd.f32 %v561_v37, %v560_v49  ;;  %v567_v21 = vsel %vm223_vm0, %v950_v43, 0.0 }
  0x4d   :  { %v568_v56 = vsel %vm223_vm0, %v955_v53, 0.0  ;;  %v570_v42 = vsel %vm223_vm0, %v456_v31, 0.0  ;;  %v572_v52 = vsel %vm223_vm0, %v490_v35, 0.0  ;;  %v574_v57 = vsel %vm223_vm0, %v390_v51, 0.0 }
  0x4e   :  { %v559_v54 = vadd.f32 %v558_v9, %v557_v29  ;;  %v564_v60 = vadd.f32 %v563_v45, %v562_v55  ;;  %v569_v24 = vadd.f32 %v568_v56, %v567_v21  ;;  %v575_v61 = vsel %vm223_vm0, %v424_v59, 0.0 }
  0x4f   :  { %v576_v62 = vadd.f32 %v575_v61, %v574_v57  ;;  %v577_v63 = vsel %vm223_vm0, %v458_v4, 0.0  ;;  %v579_v0 = vsel %vm223_vm0, %v492_v19, 0.0  ;;  %v581_v43 = vmul.f32 0.25, %v531_v39 }
  0x50   :  { %v566_v1 = vadd.f32 %v565_v11, %v564_v60  ;;  %v571_v2 = vadd.f32 %v570_v42, %v569_v24  ;;  %v582_v53 = vmul.f32 0.25, %v538_v44  ;;  %v583_v28 = vmul.f32 0.25, %v545_v17 }
  0x51   :  { %v578_v31 = vadd.f32 %v577_v63, %v576_v62  ;;  %v584_v12 = vmul.f32 0.25, %v552_v25  ;;  %v585_v35 = vmul.f32 0.25, %v559_v54  ;;  %v589_v50 = vadd.f32 1e-08, %v581_v43 }
  0x52   :  { %v573_v51 = vadd.f32 %v572_v52, %v571_v2  ;;  %v586_v58 = vmul.f32 0.25, %v566_v1  ;;  %v590_v13 = vadd.f32 1e-08, %v582_v53  ;;  %v591_v14 = vadd.f32 1e-08, %v583_v28 }
  0x53   :  { %v580_v18 = vadd.f32 %v579_v0, %v578_v31  ;;  %718 = vrsqrt.f32 %v589_v50  ;;  %v1006_v20 = vadd.f32 1e-08, %v584_v12  ;;  %v1008_v19 = vadd.f32 1e-08, %v585_v35 }
  0x54   :  { %v587_v59 = vmul.f32 0.25, %v573_v51  ;;  %720 = vrsqrt.f32 %v590_v13  ;;  %v1010_v23 = vadd.f32 1e-08, %v586_v58  ;;  %vm599_vm1 = vcmp.eq.f32.partialorder %v589_v50, inf }
  0x55   :  { %v588_v4 = vmul.f32 0.25, %v580_v18  ;;  %722 = vrsqrt.f32 %v591_v14  ;;  %vm601_vm2 = vcmp.eq.f32.partialorder %v589_v50, 0.0  ;;  %v602_v22 = vand.u32 2147483648, %v589_v50 }
  0x56   :  { %v1012_v27 = vadd.f32 1e-08, %v587_v59  ;;  %724 = vrsqrt.f32 %v1006_v20  ;;  %vm606_vm3 = vcmp.eq.f32.partialorder %v590_v13, inf  ;;  %vm608_vm4 = vcmp.eq.f32.partialorder %v590_v13, 0.0 }
  0x57   :  { %v1014_v32 = vadd.f32 1e-08, %v588_v4  ;;  %726 = vrsqrt.f32 %v1008_v19  ;;  %v609_v26 = vand.u32 2147483648, %v590_v13  ;;  %vm613_vm5 = vcmp.eq.f32.partialorder %v591_v14, inf }
  0x58   :  { %728 = vrsqrt.f32 %v1010_v23  ;;  %vm615_vm6 = vcmp.eq.f32.partialorder %v591_v14, 0.0  ;;  %v616_v36 = vand.u32 2147483648, %v591_v14  ;;  %vm620_vm7 = vcmp.eq.f32.partialorder %v1006_v20, inf }
  0x59   :  { %730 = vrsqrt.f32 %v1012_v27  ;;  %vm622_vm8 = vcmp.eq.f32.partialorder %v1006_v20, 0.0  ;;  %v623_v38 = vand.u32 2147483648, %v1006_v20  ;;  %vm627_vm9 = vcmp.eq.f32.partialorder %v1008_v19, inf }
  0x5a   :  { %732 = vrsqrt.f32 %v1014_v32  ;;  %vm629_vm10 = vcmp.eq.f32.partialorder %v1008_v19, 0.0  ;;  %v630_v39 = vand.u32 2147483648, %v1008_v19  ;;  %vm634_vm11 = vcmp.eq.f32.partialorder %v1010_v23, inf }
  0x5b   :  { %vm636_vm12 = vcmp.eq.f32.partialorder %v1010_v23, 0.0  ;;  %v637_v10 = vand.u32 2147483648, %v1010_v23  ;;  %vm641_vm13 = vcmp.eq.f32.partialorder %v1012_v27, inf  ;;  %vm643_vm14 = vcmp.eq.f32.partialorder %v1012_v27, 0.0 }
  0x5c   :  { %v644_v46 = vand.u32 2147483648, %v1012_v27  ;;  %vm648_vm15 = vcmp.eq.f32.partialorder %v1014_v32, inf  ;;  %v651_v54 = vand.u32 2147483648, %v1014_v32  ;;  %v782_v18 = vmov 269488144  }
  0x5d   :  { %v674_v59 = vunpack.c.l.s4 %v782_v18 }
  0x60   :  { %v719_v5 = vpop.eup %718 }
  0x61   :  { %v598_v33 = vmul.f32 %v719_v5, %v589_v50  ;;  %v721_v30 = vpop.eup %720 }
  0x62   :  { %v723_v40 = vpop.eup %722  ;;  %v605_v6 = vmul.f32 %v721_v30, %v590_v13 }
  0x63   :  { %v600_v34 = vsel %vm599_vm1, %v589_v50, %v598_v33  ;;  %v612_v41 = vmul.f32 %v723_v40, %v591_v14  ;;  %v725_v16 = vpop.eup %724  ;;  %vm650_vm1 = vcmp.eq.f32.partialorder %v1014_v32, 0.0 }
  0x64   :  { %v603_v8 = vsel %vm601_vm2, %v602_v22, %v600_v34  ;;  %v607_v44 = vsel %vm606_vm3, %v590_v13, %v605_v6  ;;  %v727_v47 = vpop.eup %726  ;;  %v619_v9 = vmul.f32 %v725_v16, %v1006_v20 }
  0x65   :  { %v653_v15 = vsel %vm223_vm0, %v603_v8, 0.0  ;;  %v610_v48 = vsel %vm608_vm4, %v609_v26, %v607_v44  ;;  %v614_v7 = vsel %vm613_vm5, %v591_v14, %v612_v41  ;;  %v729_v49 = vpop.eup %728  ;;  %v626_v37 = vmul.f32 %v727_v47, %v1008_v19 }
  0x66   :  { %v617_v17 = vsel %vm615_vm6, %v616_v36, %v614_v7  ;;  %v654_v45 = vsel %vm223_vm0, %v610_v48, 0.0  ;;  %v731_v11 = vpop.eup %730  ;;  %v621_v25 = vsel %vm620_vm7, %v1006_v20, %v619_v9  ;;  %v633_v29 = vmul.f32 %v729_v49, %v1010_v23 }
  0x67   :  { %v655_v55 = vadd.f32 %v654_v45, %v653_v15  ;;  %v656_v21 = vsel %vm223_vm0, %v617_v17, 0.0  ;;  %v733_v56 = vpop.eup %732  ;;  %v624_v42 = vsel %vm622_vm8, %v623_v38, %v621_v25  ;;  %v628_v52 = vsel %vm627_vm9, %v1008_v19, %v626_v37 }
  0x68   :  { %v640_v57 = vmul.f32 %v731_v11, %v1012_v27  ;;  %v631_v60 = vsel %vm629_vm10, %v630_v39, %v628_v52  ;;  %v635_v24 = vsel %vm634_vm11, %v1010_v23, %v633_v29  ;;  %v647_v61 = vmul.f32 %v733_v56, %v1014_v32 }
  0x69   :  { %v657_v62 = vadd.f32 %v656_v21, %v655_v55  ;;  %v638_v63 = vsel %vm636_vm12, %v637_v10, %v635_v24  ;;  %v658_v43 = vsel %vm223_vm0, %v624_v42, 0.0  ;;  %v660_v1 = vsel %vm223_vm0, %v631_v60, 0.0 }
  0x6a   :  { %v642_v0 = vsel %vm641_vm13, %v1012_v27, %v640_v57  ;;  %v649_v53 = vsel %vm648_vm15, %v1014_v32, %v647_v61  ;;  %v662_v31 = vsel %vm223_vm0, %v638_v63, 0.0  ;;  %v675_v20 = vunpack.c.0.s8 %v674_v59 }
  0x6b   :  { %v645_v2 = vsel %vm643_vm14, %v644_v46, %v642_v0  ;;  %v659_v28 = vadd.f32 %v658_v43, %v657_v62  ;;  %v652_v12 = vsel %vm650_vm1, %v651_v54, %v649_v53 }
  0x6c   :  { %v664_v50 = vsel %vm223_vm0, %v645_v2, 0.0  ;;  %v666_v58 = vsel %vm223_vm0, %v652_v12, 0.0  ;;  %v678_v4 = vsub.s32 %v675_v20, %v799_v3 }
  0x6d   :  { %v661_v35 = vadd.f32 %v660_v1, %v659_v28 }
  0x6f   :  { %v663_v51 = vadd.f32 %v662_v31, %v661_v35 }
  0x71   :  { %v665_v13 = vadd.f32 %v664_v50, %v663_v51 }
  0x73   :  { %v667_v14 = vadd.f32 %v666_v58, %v665_v13 }
  0x75   :  { %668 = vadd.xlane.f32.xlu0 %v667_v14 }
  0xfe   :  { %v669_v19 = vpop.xlane.xlu0 %668 }
  0xff   :  { %v671_v23 = vmul.f32 0.0009765625, %v669_v19 }
 0x101   :  { %v679_v27 = vrot.slane %v671_v23, %v678_v4 }
 0x103   :  { %681 = vst [vmem:[#allocation5 + $0x10] sm:$0xf] %v679_v27  ;;  %682 = vst [vmem:[#allocation5 + $0x24] sm:$0xf] %v679_v27 }
 0x104   :  { %683 = vst [vmem:[#allocation5 + $0x38] sm:$0xf] %v679_v27  ;;  %684 = vst [vmem:[#allocation5 + $0x4c] sm:$0xf] %v679_v27 }
 0x105   :  { %765 = shalt.err (!%p762_p9)
}
 0x106   :  { %s784_s15 = smov 320   ;;  %s785_s16 = smov 20  }
 0x107   :  { %696 = dma.vmem_to_hbm [thread:$0]  %s691_s13, 1280, %s1085_s1, [#allocation4], %s784_s15, %s784_s15, %s785_s16  }
 0x108   :  { %776 = dma.done.wait [#allocation4], 1280  }
 0x109   :  { %777 = vsyncadd [#allocation4], 4294966016 }
 0x10a   :  { %700 = vsyncpa [#allocation3], 1 }
 0x10b   :  { %701 = vsyncpa [#allocation4], 1 }

</bundles_post_ra>
